<compile_context>
chip_gen: v5e
topology: v5e:2x2
jax: 0.10.0
libtpu: 0.0.40
codegen_flags: <defaults>
</compile_context>

<pallas_src>
import jax
import jax.numpy as jnp
from jax.experimental import pallas as pl
from jax.experimental.pallas import tpu as pltpu


# ----------------------------- Pallas kernel ------------------------------- #
def simple_attention_kernel(m_ref, w_ref, pool_ref, alpha_ref):
    """
    m_ref:     (S, TB, D)  utterance features, original seq-major layout
    w_ref:     (1, D)      nn.Linear(input_dim, 1, bias=False).weight
    pool_ref:  (TB, D)     attention-pooled features (batch-major, no unit axis)
    alpha_ref: (TB, S)     attention weights (batch-major)
    """
    m = m_ref[...]                                                 # (S, TB, D)
    w = w_ref[...]                                                 # (1, D)

    # scores[s, b] = <M[s, b, :], w>  : VPU multiply + lane (D) reduction.
    scores = jnp.sum(m * w[None, :, :], axis=-1, keepdims=True)   # (S, TB, 1)

    # Numerically stable softmax over the sequence (leading) axis.  The
    # reductions over S are plain vreg max/add accumulations (VALU only).
    smax = jnp.max(scores, axis=0, keepdims=True)                 # (1, TB, 1)
    e = jnp.exp(scores - smax)                                     # (S, TB, 1) EUP
    denom = jnp.sum(e, axis=0, keepdims=True)                      # (1, TB, 1)
    inv = pl.reciprocal(denom, approx=True)                        # EUP slot
    inv = inv * (2.0 - denom * inv)                                # Newton step -> f32 acc.
    alpha = e * inv                                                # (S, TB, 1)

    # Attention pooling on the VPU: per-(s, b) scalar broadcast along D,
    # accumulated over S.  (No q=1 MXU matmul.)
    pool_ref[...] = jnp.sum(alpha * m, axis=0)                     # (TB, D)

    # alpha is tiny (B*S values, ~1/D of the M traffic): store it batch-major.
    alpha_ref[...] = jnp.transpose(jnp.squeeze(alpha, axis=-1))    # (TB, S)


# ------------------------------- wrapper ----------------------------------- #
def _round_up(v: int, m: int) -> int:
    return (v + m - 1) // m * m


def simple_attention_forward(M, w_scalar, *, vmem_budget_bytes=None,
                             min_grid_steps=None):
    """
    M:        (seq_len, batch, input_dim) float32  (PyTorch layout, used as-is)
    w_scalar: (1, input_dim) float32               (Linear(input_dim,1,bias=False).weight)
    returns:  attn_pool (batch, input_dim), alpha (batch, 1, seq_len)
    """
    S, B, D = M.shape
    M = M.astype(jnp.float32)
    w_scalar = w_scalar.astype(jnp.float32)

    # ---- generation-aware defaults ----------------------------------------
    try:
        vmem_cap = int(pltpu.get_tpu_info().vmem_capacity_bytes)
    except Exception:
        vmem_cap = 64 * 2 ** 20            # conservative (v7x per-TC VMEM)
    if vmem_budget_bytes is None:
        vmem_budget_bytes = vmem_cap // 4  # budget for the M block + temporaries
    if min_grid_steps is None:
        try:
            dev = jax.devices()[0]
            # v7x exposes 2 TensorCores per chip; give each at least one step.
            min_grid_steps = int(getattr(dev, "num_cores", 0) or 1)
        except Exception:
            min_grid_steps = 1

    # ---- batch tiling: biggest TB whose M block + pooling temp fit VMEM ----
    d_lanes = _round_up(max(D, 128), 128)          # lane footprint per row in VMEM
    # 2x double-buffered M block + 1x pooling intermediate, per batch row, f32.
    bytes_per_row = 3 * S * d_lanes * 4
    cap = max(8, (vmem_budget_bytes // bytes_per_row) // 8 * 8)

    B8 = _round_up(B, 8)
    max_steps = max(1, B8 // 8)
    nsteps = min(max(min_grid_steps, pl.cdiv(B8, cap)), max_steps)

    if nsteps <= 1 and B <= cap:
        # Single full-extent block: no batch padding, no extra HBM copy of M.
        TB, B_pad, nsteps = B, B, 1
        M_in = M
    else:
        TB = _round_up(pl.cdiv(B8, nsteps), 8)     # <= cap by construction
        B_pad = TB * nsteps
        # Only pad the batch axis, and only when batch blocking requires it.
        M_in = M if B_pad == B else jnp.pad(M, ((0, 0), (0, B_pad - B), (0, 0)))

    # ---- explicit VMEM limit (v5e default scoped VMEM is only 16 MiB) ------
    tb8 = _round_up(TB, 8)
    s_lanes = _round_up(max(S, 128), 128)
    est = (3 * S * tb8 * d_lanes            # M block (x2 buffers) + pooling temp
           + 2 * 8 * d_lanes                # weight block (x2 buffers)
           + 2 * tb8 * d_lanes              # attn_pool output block (x2 buffers)
           + 2 * tb8 * s_lanes              # alpha output block (x2 buffers)
           ) * 4
    vmem_limit = int(min(max(2 * est, 32 * 2 ** 20), vmem_cap))

    pool_pad, alpha_pad = pl.pallas_call(
        simple_attention_kernel,
        out_shape=(jax.ShapeDtypeStruct((B_pad, D), jnp.float32),
                   jax.ShapeDtypeStruct((B_pad, S), jnp.float32)),
        grid_spec=pltpu.PrefetchScalarGridSpec(
            num_scalar_prefetch=0,
            grid=(nsteps,),
            in_specs=[
                pl.BlockSpec((S, TB, D), lambda i: (0, i, 0)),   # M, in place
                pl.BlockSpec((1, D), lambda i: (0, 0)),          # scalar weight
            ],
            out_specs=[
                pl.BlockSpec((TB, D), lambda i: (i, 0)),         # attn_pool
                pl.BlockSpec((TB, S), lambda i: (i, 0)),         # alpha
            ],
        ),
        compiler_params=pltpu.CompilerParams(
            dimension_semantics=("parallel",),
            vmem_limit_bytes=vmem_limit,
        ),
    )(M_in, w_scalar)

    attn_pool = pool_pad[:B]                       # (B, D)
    alpha = alpha_pad[:B][:, None, :]              # (B, 1, S) == permute(1, 2, 0)
    return attn_pool, alpha


# --------------------------- pure-JAX reference ----------------------------- #
def simple_attention_reference(M, w_scalar):
    scale = jnp.einsum("sbd,xd->sbx", M, w_scalar)     # (S, B, 1)
    alpha = jax.nn.softmax(scale, axis=0)              # softmax over seq dim
    alpha_p = jnp.transpose(alpha, (1, 2, 0))          # (B, 1, S)
    attn_pool = jnp.matmul(alpha_p, jnp.transpose(M, (1, 0, 2)))[:, 0, :]
    return attn_pool, alpha_p


# --------------------------------- main ------------------------------------- #
if __name__ == "__main__":
    # Deliberately unaligned small shapes (S, B not multiples of 8, D not of 128).
    S, B, D = 12, 6, 100      # seq_len, batch, input_dim

    key = jax.random.PRNGKey(0)
    k1, k2 = jax.random.split(key)
    M = jax.random.normal(k1, (S, B, D), jnp.float32)
    w_scalar = 0.1 * jax.random.normal(k2, (1, D), jnp.float32)

    attn_pool, alpha = simple_attention_forward(M, w_scalar)
    attn_pool, alpha = jax.block_until_ready((attn_pool, alpha))

    ref_pool, ref_alpha = simple_attention_reference(M, w_scalar)
    assert attn_pool.shape == (B, D), attn_pool.shape
    assert alpha.shape == (B, 1, S), alpha.shape
    assert jnp.allclose(attn_pool, ref_pool, atol=1e-4, rtol=1e-4), "attn_pool mismatch"
    assert jnp.allclose(alpha, ref_alpha, atol=1e-4, rtol=1e-4), "alpha mismatch"

    # Second configuration: force >=2 grid steps (v7x-style megacore split) to
    # exercise the batch-blocking + minimal-padding path.
    S2, B2, D2 = 10, 40, 72
    k3, k4 = jax.random.split(k2)
    M2 = jax.random.normal(k3, (S2, B2, D2), jnp.float32)
    w2 = 0.1 * jax.random.normal(k4, (1, D2), jnp.float32)

    pool2, alpha2 = simple_attention_forward(M2, w2, min_grid_steps=2)
    pool2, alpha2 = jax.block_until_ready((pool2, alpha2))
    rp2, ra2 = simple_attention_reference(M2, w2)
    assert pool2.shape == (B2, D2) and alpha2.shape == (B2, 1, S2)
    assert jnp.allclose(pool2, rp2, atol=1e-4, rtol=1e-4), "attn_pool (blocked) mismatch"
    assert jnp.allclose(alpha2, ra2, atol=1e-4, rtol=1e-4), "alpha (blocked) mismatch"

    print("KERNEL_OK")
</pallas_src>

<mosaic_0001>
module attributes {stable_mosaic.version = 11 : i64} {
  func.func @simple_attention_kernel(%arg0: i32, %arg1: memref<12x6x100xf32, #tpu.memory_space<vmem>>, %arg2: memref<1x100xf32, #tpu.memory_space<vmem>>, %arg3: memref<6x100xf32, #tpu.memory_space<vmem>>, %arg4: memref<6x12xf32, #tpu.memory_space<vmem>>) attributes {dimension_semantics = [#tpu.dimension_semantics<parallel>], iteration_bounds = array<i64: 1>, scalar_prefetch = 0 : i64, scratch_operands = 0 : i64, tpu.core_type = #tpu.core_type<tc>, window_params = [{transform_indices = @transform_0, window_bounds = array<i64: 12, 6, 100>}, {pipeline_mode = #tpu.pipeline_mode<synchronous>, transform_indices = @transform_1, window_bounds = array<i64: 1, 100>}, {transform_indices = @transform_2, window_bounds = array<i64: 6, 100>}, {transform_indices = @transform_3, window_bounds = array<i64: 6, 12>}]} {
    %c0 = arith.constant 0 : index
    %c0_0 = arith.constant 0 : index
    %c0_1 = arith.constant 0 : index
    %0 = vector.load %arg1[%c0, %c0_0, %c0_1] : memref<12x6x100xf32, #tpu.memory_space<vmem>>, vector<12x6x100xf32>
    %c0_2 = arith.constant 0 : index
    %c0_3 = arith.constant 0 : index
    %1 = vector.load %arg2[%c0_2, %c0_3] : memref<1x100xf32, #tpu.memory_space<vmem>>, vector<1x100xf32>
    %2 = vector.shape_cast %1 : vector<1x100xf32> to vector<1x1x100xf32>
    %3 = vector.broadcast %2 : vector<1x1x100xf32> to vector<12x6x100xf32>
    %4 = arith.mulf %0, %3 : vector<12x6x100xf32>
    %cst = arith.constant dense<0.000000e+00> : vector<12x6xf32>
    %5 = vector.multi_reduction <add>, %4, %cst [2] : vector<12x6x100xf32> to vector<12x6xf32>
    %6 = vector.shape_cast %5 : vector<12x6xf32> to vector<12x6x1xf32>
    %cst_4 = arith.constant dense<0xFF800000> : vector<6x1xf32>
    %7 = vector.multi_reduction <maximumf>, %6, %cst_4 [0] : vector<12x6x1xf32> to vector<6x1xf32>
    %8 = vector.shape_cast %7 : vector<6x1xf32> to vector<1x6x1xf32>
    %9 = vector.broadcast %8 : vector<1x6x1xf32> to vector<12x6x1xf32>
    %10 = arith.subf %6, %9 : vector<12x6x1xf32>
    %11 = math.exp %10 : vector<12x6x1xf32>
    %cst_5 = arith.constant dense<0.000000e+00> : vector<6x1xf32>
    %12 = vector.multi_reduction <add>, %11, %cst_5 [0] : vector<12x6x1xf32> to vector<6x1xf32>
    %13 = vector.shape_cast %12 : vector<6x1xf32> to vector<1x6x1xf32>
    %14 = tpu.reciprocal %13 {approx = true} : vector<1x6x1xf32> -> vector<1x6x1xf32>
    %15 = arith.mulf %13, %14 : vector<1x6x1xf32>
    %cst_6 = arith.constant 2.000000e+00 : f32
    %16 = vector.broadcast %cst_6 : f32 to vector<1x6x1xf32>
    %17 = arith.subf %16, %15 : vector<1x6x1xf32>
    %18 = arith.mulf %14, %17 : vector<1x6x1xf32>
    %19 = vector.broadcast %18 : vector<1x6x1xf32> to vector<12x6x1xf32>
    %20 = arith.mulf %11, %19 : vector<12x6x1xf32>
    %21 = vector.broadcast %20 : vector<12x6x1xf32> to vector<12x6x100xf32>
    %22 = arith.mulf %21, %0 : vector<12x6x100xf32>
    %cst_7 = arith.constant dense<0.000000e+00> : vector<6x100xf32>
    %23 = vector.multi_reduction <add>, %22, %cst_7 [0] : vector<12x6x100xf32> to vector<6x100xf32>
    %c0_8 = arith.constant 0 : index
    %c0_9 = arith.constant 0 : index
    %24 = vector.load %arg3[%c0_8, %c0_9] : memref<6x100xf32, #tpu.memory_space<vmem>>, vector<6x100xf32>
    tpu.vector_store %arg3[%c0_8, %c0_9], %23 {strides = array<i32>} : memref<6x100xf32, #tpu.memory_space<vmem>>, vector<6x100xf32>,
    %25 = vector.shape_cast %20 : vector<12x6x1xf32> to vector<12x6xf32>
    %26 = tpu.transpose %25, [1, 0] : vector<12x6xf32> -> vector<6x12xf32>
    %c0_10 = arith.constant 0 : index
    %c0_11 = arith.constant 0 : index
    %27 = vector.load %arg4[%c0_10, %c0_11] : memref<6x12xf32, #tpu.memory_space<vmem>>, vector<6x12xf32>
    tpu.vector_store %arg4[%c0_10, %c0_11], %26 {strides = array<i32>} : memref<6x12xf32, #tpu.memory_space<vmem>>, vector<6x12xf32>,
    return
  }
  func.func @transform_0(%arg0: i32) -> (i32, i32, i32) {
    %c0_i32 = arith.constant 0 : i32
    %c0_i32_0 = arith.constant 0 : i32
    %c0_i32_1 = arith.constant 0 : i32
    return %c0_i32, %arg0, %c0_i32_0 : i32, i32, i32
  }
  func.func @transform_1(%arg0: i32) -> (i32, i32) {
    %c0_i32 = arith.constant 0 : i32
    %c0_i32_0 = arith.constant 0 : i32
    %c0_i32_1 = arith.constant 0 : i32
    return %c0_i32, %c0_i32_0 : i32, i32
  }
  func.func @transform_2(%arg0: i32) -> (i32, i32) {
    %c0_i32 = arith.constant 0 : i32
    %c0_i32_0 = arith.constant 0 : i32
    return %arg0, %c0_i32 : i32, i32
  }
  func.func @transform_3(%arg0: i32) -> (i32, i32) {
    %c0_i32 = arith.constant 0 : i32
    %c0_i32_0 = arith.constant 0 : i32
    return %arg0, %c0_i32 : i32, i32
  }
}

</mosaic_0001>

<bundles_post_ra>
// kernel: tpu_custom_call.1
= control target key start
LH: loop header
LB: loop body
LE: loop exit
PB: predicated region body
PF: predicated region fallthrough
CT: control target
= control target key end

     0   :  { %9 = vsyncpa [#allocation3], 0  ;;  %s663_s0 = inlined_call_operand.hbm [shape: f32[12,6,100], index: 0, kind: input, shape index: {}]   ;;  %s664_s1 = inlined_call_operand.hbm [shape: f32[1,100], index: 1, kind: input, shape index: {}]   ;;  %s665_s2 = inlined_call_operand.hbm [shape: f32[6,100], index: 2, kind: output, shape index: {0}]   ;;  %s666_s3 = inlined_call_operand.hbm [shape: f32[6,12], index: 3, kind: output, shape index: {1}]  }
   0x1   :  { %10 = vsyncpa [#allocation6], 0 }
   0x2   :  { %11 = vsyncpa [#allocation4], 0 }
   0x3   :  { %12 = vsyncpa [#allocation9], 0  ;;  %s17_s14 = sshll.u32 %s663_s0, 4  ;;  %s496_s15 = smov [#allocation2]   ;;  %s18_s14 = int_to_ptr.hbm [resolvable:$true] %s17_s14 }
   0x4   :  { %s19_s16 = sshll.u32 %s496_s15, 4  ;;  %s31_s19 = sshll.u32 %s664_s1, 4  ;;  %s20_s16 = int_to_ptr.vmem [resolvable:$true] %s19_s16  ;;  %s32_s19 = int_to_ptr.hbm [resolvable:$true] %s31_s19 }
   0x5   :  { %s497_s20 = smov 128   ;;  %s498_s21 = smov 8  }
   0x6   :  { %25 = dma.hbm_to_vmem [thread:$0]  %s18_s14, 1536, %s20_s16, [#allocation3], %s497_s20, %s497_s20, %s498_s21  }
   0x7   :  { %s499_s22 = smov [#allocation5]  }
   0x8   :  { %s33_s23 = sshll.u32 %s499_s22, 4  ;;  %s34_s23 = int_to_ptr.vmem [resolvable:$true] %s33_s23 }
   0x9   :  { %36 = dma.hbm_to_vmem [thread:$0]  %s32_s19, 16, %s34_s23, [#allocation6]  }
   0xa   :  { %488 = dma.done.wait [#allocation3], 1536  }
   0xb   :  { %489 = vsyncadd [#allocation3], 4294965760 }
   0xc   :  { %490 = dma.done.wait [#allocation6], 16  }
   0xd   :  { %491 = vsyncadd [#allocation6], 4294967280  ;;  %v528_v0 = vld [vmem:[#allocation2 + $0x20] sm:$0x3f]  ;;  %vm73_vm0 = vcmask 816128   ;;  %vm110_vm1 = vcmask 1045504  }
   0xe   :  { %v365_v1 = vld [vmem:[#allocation5] ss:$0 sm:$0xff]  ;;  %v530_v2 = vld [vmem:[#allocation2 + $0x10] sm:$0x3f]  ;;  %v537_v7 = vld [vmem:[#allocation2 + $0x28] sm:$0x3f] }
   0xf   :  { %v532_v3 = vld [vmem:[#allocation2] sm:$0x3f]  ;;  %v65_v4 = vmul.f32 %v365_v1, %v528_v0  ;;  %v63_v5 = vmul.f32 %v365_v1, %v530_v2  ;;  %v539_v8 = vld [vmem:[#allocation2 + $0x18] sm:$0x3f]  ;;  %v544_v12 = vld [vmem:[#allocation2 + $0x8] sm:$0x3f]  ;;  %v66_v13 = vmul.f32 %v365_v1, %v537_v7 }
  0x10   :  { %v61_v6 = vmul.f32 %v365_v1, %v532_v3  ;;  %v64_v14 = vmul.f32 %v365_v1, %v539_v8  ;;  %v62_v15 = vmul.f32 %v365_v1, %v544_v12  ;;  %v552_v19 = vld [vmem:[#allocation2 + $0x40] sm:$0x3f]  ;;  %v554_v20 = vld [vmem:[#allocation2 + $0x38] sm:$0x3f]  ;;  %v556_v21 = vld [vmem:[#allocation2 + $0x30] sm:$0x3f] }
  0x11   :  { %v86_v9 = vsel %vm73_vm0, %v65_v4, 0.0  ;;  %v80_v10 = vsel %vm73_vm0, %v63_v5, 0.0  ;;  %v89_v16 = vsel %vm73_vm0, %v66_v13, 0.0  ;;  %v69_v22 = vmul.f32 %v365_v1, %v552_v19  ;;  %v564_v28 = vld [vmem:[#allocation2 + $0x58] sm:$0x3f]  ;;  %s331_s24 = sshll.u32 %s665_s2, 4  ;;  %s332_s24 = int_to_ptr.hbm [resolvable:$true] %s331_s24 }
  0x12   :  { %v74_v11 = vsel %vm73_vm0, %v61_v6, 0.0  ;;  %87 = vadd.xlane.f32.xlu2 %v86_v9  ;;  %81 = vadd.xlane.f32.xlu1 %v80_v10  ;;  %v83_v17 = vsel %vm73_vm0, %v64_v14, 0.0  ;;  %v77_v18 = vsel %vm73_vm0, %v62_v15, 0.0  ;;  %v68_v23 = vmul.f32 %v365_v1, %v554_v20  ;;  %v566_v29 = vld [vmem:[#allocation2 + $0x50] sm:$0x3f]  ;;  %s500_s25 = smov [#allocation7]  }
  0x13   :  { %75 = vadd.xlane.f32.xlu0 %v74_v11  ;;  %v67_v24 = vmul.f32 %v365_v1, %v556_v21  ;;  %v98_v25 = vsel %vm73_vm0, %v69_v22, 0.0  ;;  %v568_v30 = vld [vmem:[#allocation2 + $0x48] sm:$0x3f]  ;;  %v72_v31 = vmul.f32 %v365_v1, %v564_v28  ;;  %v71_v32 = vmul.f32 %v365_v1, %v566_v29  ;;  %s329_s26 = sshll.u32 %s500_s25, 4  ;;  %s501_s27 = smov [#allocation8]   ;;  %s330_s26 = int_to_ptr.vmem [resolvable:$true] %s329_s26 }
  0x14   :  { %v95_v26 = vsel %vm73_vm0, %v68_v23, 0.0  ;;  %v70_v33 = vmul.f32 %v365_v1, %v568_v30  ;;  %vm271_vm2 = vcmask 1041409   ;;  %vm273_vm3 = vcmask 1042434   ;;  %s340_s28 = sshll.u32 %s501_s27, 4  ;;  %s342_s4 = sshll.u32 %s666_s3, 4  ;;  %s341_s28 = int_to_ptr.vmem [resolvable:$true] %s340_s28  ;;  %s343_s4 = int_to_ptr.hbm [resolvable:$true] %s342_s4 }
  0x15   :  { %v92_v27 = vsel %vm73_vm0, %v67_v24, 0.0  ;;  %v107_v34 = vsel %vm73_vm0, %v72_v31, 0.0  ;;  %v104_v35 = vsel %vm73_vm0, %v71_v32, 0.0  ;;  %vm275_vm4 = vcmask 1043459  }
  0x16   :  { %v101_v36 = vsel %vm73_vm0, %v70_v33, 0.0  ;;  %vm277_vm5 = vcmask 1044484   ;;  %vm279_vm6 = vcmask 1045509   ;;  %vm281_vm7 = vcmask 1046534  }
  0x17   :  { %vm283_vm8 = vcmask 1047559   ;;  %vm322_vm9 = vcmask 95232  }
  0x1a   :  { %90 = vadd.xlane.f32.xlu2 %v89_v16  ;;  %84 = vadd.xlane.f32.xlu1 %v83_v17 }
  0x1b   :  { %78 = vadd.xlane.f32.xlu0 %v77_v18 }
  0x22   :  { %99 = vadd.xlane.f32.xlu2 %v98_v25  ;;  %96 = vadd.xlane.f32.xlu1 %v95_v26 }
  0x23   :  { %93 = vadd.xlane.f32.xlu0 %v92_v27 }
  0x2a   :  { %108 = vadd.xlane.f32.xlu2 %v107_v34  ;;  %105 = vadd.xlane.f32.xlu1 %v104_v35 }
  0x2b   :  { %102 = vadd.xlane.f32.xlu0 %v101_v36 }
  0x85   :  { %v88_v37 = vpop.xlane.xlu2 %87  ;;  %v82_v38 = vpop.xlane.xlu1 %81 }
  0x86   :  { %v76_v39 = vpop.xlane.xlu0 %75  ;;  %v115_v48 = vsel %vm110_vm1, %v88_v37, -inf  ;;  %v113_v52 = vsel %vm110_vm1, %v82_v38, -inf }
  0x87   :  { %v111_v49 = vsel %vm110_vm1, %v76_v39, -inf }
  0x88   :  { %v116_v59 = vmax.f32 %v111_v49, %v115_v48 }
  0x8d   :  { %v91_v40 = vpop.xlane.xlu2 %90  ;;  %v85_v41 = vpop.xlane.xlu1 %84 }
  0x8e   :  { %v79_v42 = vpop.xlane.xlu0 %78  ;;  %v117_v50 = vsel %vm110_vm1, %v91_v40, -inf  ;;  %v114_v53 = vsel %vm110_vm1, %v85_v41, -inf }
  0x8f   :  { %v112_v51 = vsel %vm110_vm1, %v79_v42, -inf }
  0x90   :  { %v118_v60 = vmax.f32 %v112_v51, %v117_v50 }
  0x95   :  { %v100_v43 = vpop.xlane.xlu2 %99  ;;  %v97_v44 = vpop.xlane.xlu1 %96 }
  0x96   :  { %v94_v45 = vpop.xlane.xlu0 %93  ;;  %v121_v46 = vsel %vm110_vm1, %v97_v44, -inf  ;;  %v123_v54 = vsel %vm110_vm1, %v100_v43, -inf }
  0x97   :  { %v119_v47 = vsel %vm110_vm1, %v94_v45, -inf  ;;  %v122_v55 = vmax.f32 %v114_v53, %v121_v46  ;;  %v124_v6 = vmax.f32 %v116_v59, %v123_v54 }
  0x98   :  { %v120_v56 = vmax.f32 %v113_v52, %v119_v47 }
  0x9d   :  { %v585_v57 = vpop.xlane.xlu2 %108  ;;  %v106_v58 = vpop.xlane.xlu1 %105 }
  0x9e   :  { %v129_v61 = vsel %vm110_vm1, %v585_v57, -inf  ;;  %v127_v62 = vsel %vm110_vm1, %v106_v58, -inf  ;;  %v103_v63 = vpop.xlane.xlu0 %102 }
  0x9f   :  { %v130_v1 = vmax.f32 %v122_v55, %v129_v61  ;;  %v128_v4 = vmax.f32 %v120_v56, %v127_v62  ;;  %v125_v5 = vsel %vm110_vm1, %v103_v63, -inf }
  0xa0   :  { %v126_v9 = vmax.f32 %v118_v60, %v125_v5 }
  0xa1   :  { %v132_v10 = vmax.f32 %v128_v4, %v130_v1 }
  0xa2   :  { %v131_v11 = vmax.f32 %v124_v6, %v126_v9 }
  0xa4   :  { %v133_v13 = vmax.f32 %v131_v11, %v132_v10 }
  0xa6   :  { %v134_v14 = vsub.f32 %v76_v39, %v133_v13  ;;  %v135_v15 = vsub.f32 %v79_v42, %v133_v13  ;;  %v136_v16 = vsub.f32 %v82_v38, %v133_v13  ;;  %v137_v17 = vsub.f32 %v85_v41, %v133_v13 }
  0xa7   :  { %v138_v18 = vsub.f32 %v88_v37, %v133_v13  ;;  %v139_v25 = vsub.f32 %v91_v40, %v133_v13  ;;  %v140_v27 = vsub.f32 %v94_v45, %v133_v13  ;;  %v141_v32 = vsub.f32 %v97_v44, %v133_v13 }
  0xa8   :  { %v146_v22 = vmul.f32 1.442695, %v134_v14  ;;  %v148_v23 = vmul.f32 1.442695, %v135_v15  ;;  %v150_v24 = vmul.f32 1.442695, %v136_v16  ;;  %v142_v34 = vsub.f32 %v100_v43, %v133_v13 }
  0xa9   :  { %v152_v26 = vmul.f32 1.442695, %v137_v17  ;;  %v154_v31 = vmul.f32 1.442695, %v138_v18  ;;  %v156_v33 = vmul.f32 1.442695, %v139_v25  ;;  %v143_v39 = vsub.f32 %v103_v63, %v133_v13 }
  0xaa   :  { %366 = vpow2.f32 %v146_v22  ;;  %v158_v35 = vmul.f32 1.442695, %v140_v27  ;;  %v160_v37 = vmul.f32 1.442695, %v141_v32  ;;  %v144_v46 = vsub.f32 %v106_v58, %v133_v13 }
  0xab   :  { %368 = vpow2.f32 %v148_v23  ;;  %v162_v47 = vmul.f32 1.442695, %v142_v34  ;;  %v145_v49 = vsub.f32 %v585_v57, %v133_v13  ;;  %v164_v50 = vmul.f32 1.442695, %v143_v39 }
  0xac   :  { %370 = vpow2.f32 %v150_v24  ;;  %v166_v54 = vmul.f32 1.442695, %v144_v46  ;;  %v257_v27 = vlaneseq }
  0xad   :  { %372 = vpow2.f32 %v152_v26  ;;  %v168_v59 = vmul.f32 1.442695, %v145_v49 }
  0xae   :  { %374 = vpow2.f32 %v154_v31  ;;  %v607_v34 = vand.u32 127, %v257_v27 }
  0xaf   :  { %376 = vpow2.f32 %v156_v33 }
  0xb0   :  { %v367_v36 = vpop.eup %366  ;;  %378 = vpow2.f32 %v158_v35 }
  0xb1   :  { %v369_v38 = vpop.eup %368  ;;  %v170_v41 = vsel %vm110_vm1, %v367_v36, 0.0  ;;  %380 = vpow2.f32 %v160_v37 }
  0xb2   :  { %v371_v40 = vpop.eup %370  ;;  %v171_v42 = vsel %vm110_vm1, %v369_v38, 0.0  ;;  %382 = vpow2.f32 %v162_v47 }
  0xb3   :  { %v373_v45 = vpop.eup %372  ;;  %v172_v44 = vadd.f32 %v171_v42, %v170_v41  ;;  %v173_v48 = vsel %vm110_vm1, %v371_v40, 0.0  ;;  %384 = vpow2.f32 %v164_v50 }
  0xb4   :  { %v375_v43 = vpop.eup %374  ;;  %v175_v52 = vsel %vm110_vm1, %v373_v45, 0.0  ;;  %386 = vpow2.f32 %v166_v54 }
  0xb5   :  { %v174_v51 = vadd.f32 %v173_v48, %v172_v44  ;;  %v377_v53 = vpop.eup %376  ;;  %v177_v56 = vsel %vm110_vm1, %v375_v43, 0.0  ;;  %388 = vpow2.f32 %v168_v59 }
  0xb6   :  { %v379_v58 = vpop.eup %378  ;;  %v179_v61 = vsel %vm110_vm1, %v377_v53, 0.0 }
  0xb7   :  { %v176_v55 = vadd.f32 %v175_v52, %v174_v51  ;;  %v381_v62 = vpop.eup %380  ;;  %v181_v63 = vsel %vm110_vm1, %v379_v58, 0.0 }
  0xb8   :  { %v383_v1 = vpop.eup %382  ;;  %v183_v5 = vsel %vm110_vm1, %v381_v62, 0.0 }
  0xb9   :  { %v178_v60 = vadd.f32 %v177_v56, %v176_v55  ;;  %v385_v6 = vpop.eup %384  ;;  %v185_v10 = vsel %vm110_vm1, %v383_v1, 0.0 }
  0xba   :  { %v387_v11 = vpop.eup %386  ;;  %v187_v14 = vsel %vm110_vm1, %v385_v6, 0.0 }
  0xbb   :  { %v180_v57 = vadd.f32 %v179_v61, %v178_v60  ;;  %v602_v15 = vpop.eup %388  ;;  %v189_v17 = vsel %vm110_vm1, %v387_v11, 0.0 }
  0xbc   :  { %v191_v22 = vsel %vm110_vm1, %v602_v15, 0.0 }
  0xbd   :  { %v182_v4 = vadd.f32 %v181_v63, %v180_v57 }
  0xbf   :  { %v184_v9 = vadd.f32 %v183_v5, %v182_v4 }
  0xc1   :  { %v186_v13 = vadd.f32 %v185_v10, %v184_v9 }
  0xc3   :  { %v188_v16 = vadd.f32 %v187_v14, %v186_v13 }
  0xc5   :  { %v190_v18 = vadd.f32 %v189_v17, %v188_v16 }
  0xc7   :  { %v192_v23 = vadd.f32 %v191_v22, %v190_v18 }
  0xc9   :  { %390 = vrcp.f32 %v192_v23 }
  0xcf   :  { %v391_v24 = vpop.eup %390 }
  0xd0   :  { %v194_v25 = vmul.f32 %v391_v24, %v192_v23 }
  0xd2   :  { %v195_v26 = vsub.f32 2.0, %v194_v25 }
  0xd4   :  { %v196_v31 = vmul.f32 %v391_v24, %v195_v26 }
  0xd6   :  { %v197_v32 = vmul.f32 %v367_v36, %v196_v31  ;;  %v198_v33 = vmul.f32 %v369_v38, %v196_v31  ;;  %v199_v35 = vmul.f32 %v371_v40, %v196_v31  ;;  %v200_v37 = vmul.f32 %v373_v45, %v196_v31 }
  0xd7   :  { %v201_v42 = vmul.f32 %v375_v43, %v196_v31  ;;  %v202_v46 = vmul.f32 %v377_v53, %v196_v31  ;;  %v206_v47 = vmul.f32 %v385_v6, %v196_v31  ;;  %v204_v44 = vmul.f32 %v381_v62, %v196_v31 }
  0xd8   :  { %v210_v39 = vmul.f32 %v198_v33, %v544_v12  ;;  %v259_v41 = vperm.slane %v197_v32, %v607_v34  ;;  %v211_v36 = vmul.f32 %v199_v35, %v530_v2  ;;  %v260_v38 = vperm.slane %v198_v33, %v607_v34 }
  0xd9   :  { %v261_v40 = vperm.slane %v199_v35, %v607_v34  ;;  %v203_v12 = vmul.f32 %v379_v58, %v196_v31  ;;  %v262_v48 = vperm.slane %v200_v37, %v607_v34  ;;  %v209_v43 = vmul.f32 %v197_v32, %v532_v3 }
  0xda   :  { %v222_v45 = vsel %vm73_vm0, %v210_v39, 0.0  ;;  %v272_v49 = vsel %vm271_vm2, %v260_v38, %v259_v41  ;;  %v205_v50 = vmul.f32 %v383_v1, %v196_v31  ;;  %v212_v51 = vmul.f32 %v200_v37, %v539_v8 }
  0xdb   :  { %v213_v2 = vmul.f32 %v201_v42, %v528_v0  ;;  %v263_v52 = vperm.slane %v201_v42, %v607_v34  ;;  %v274_v53 = vsel %vm273_vm3, %v261_v40, %v272_v49  ;;  %v224_v54 = vsel %vm73_vm0, %v211_v36, 0.0 }
  0xdc   :  { %v264_v55 = vperm.slane %v202_v46, %v607_v34  ;;  %v276_v56 = vsel %vm275_vm4, %v262_v48, %v274_v53  ;;  %v221_v58 = vsel %vm73_vm0, %v209_v43, 0.0  ;;  %v265_v59 = vperm.slane %v203_v12, %v607_v34 }
  0xdd   :  { %v278_v3 = vsel %vm277_vm5, %v263_v52, %v276_v56  ;;  %v223_v60 = vadd.f32 %v222_v45, %v221_v58  ;;  %v207_v8 = vmul.f32 %v387_v11, %v196_v31  ;;  %v266_v0 = vperm.slane %v204_v44, %v607_v34 }
  0xde   :  { %v280_v61 = vsel %vm279_vm6, %v264_v55, %v278_v3  ;;  %v267_v62 = vperm.slane %v205_v50, %v607_v34  ;;  %v268_v57 = vperm.slane %v206_v47, %v607_v34  ;;  %v214_v4 = vmul.f32 %v202_v46, %v537_v7 }
  0xdf   :  { %v282_v63 = vsel %vm281_vm7, %v265_v59, %v280_v61  ;;  %v225_v1 = vadd.f32 %v224_v54, %v223_v60  ;;  %v226_v5 = vsel %vm73_vm0, %v212_v51, 0.0  ;;  %v269_v10 = vperm.slane %v207_v8, %v607_v34 }
  0xe0   :  { %v284_v6 = vsel %vm283_vm8, %v266_v0, %v282_v63  ;;  %v215_v11 = vmul.f32 %v203_v12, %v556_v21  ;;  %v228_v13 = vsel %vm73_vm0, %v213_v2, 0.0  ;;  %v208_v14 = vmul.f32 %v602_v15, %v196_v31 }
  0xe1   :  { %290 = vxpose.xlu0.b32.start [1/2] (short) (narrow) %v284_v6, 8  ;;  %v227_v9 = vadd.f32 %v226_v5, %v225_v1  ;;  %v285_v16 = vsel %vm271_vm2, %v268_v57, %v267_v62  ;;  %v216_v18 = vmul.f32 %v204_v44, %v554_v20  ;;  %v230_v7 = vsel %vm73_vm0, %v214_v4, 0.0 }
  0xe2   :  { %v286_v23 = vsel %vm273_vm3, %v269_v10, %v285_v16  ;;  %v232_v24 = vsel %vm73_vm0, %v215_v11, 0.0  ;;  %v217_v25 = vmul.f32 %v205_v50, %v552_v19  ;;  %v270_v21 = vperm.slane %v208_v14, %v607_v34 }
  0xe3   :  { %v229_v17 = vadd.f32 %v228_v13, %v227_v9  ;;  %v218_v27 = vmul.f32 %v206_v47, %v568_v30  ;;  %v234_v15 = vsel %vm73_vm0, %v216_v18, 0.0  ;;  %v219_v20 = vmul.f32 %v207_v8, %v566_v29 }
  0xe4   :  { %v287_v31 = vsel %vm275_vm4, %v270_v21, %v286_v23  ;;  %v236_v33 = vsel %vm73_vm0, %v217_v25, 0.0  ;;  %v220_v39 = vmul.f32 %v208_v14, %v564_v28 }
  0xe5   :  { %v231_v22 = vadd.f32 %v230_v7, %v229_v17  ;;  %v238_v19 = vsel %vm73_vm0, %v218_v27, 0.0  ;;  %v240_v34 = vsel %vm73_vm0, %v219_v20, 0.0 }
  0xe6   :  { %v242_v30 = vsel %vm73_vm0, %v220_v39, 0.0 }
  0xe7   :  { %v233_v26 = vadd.f32 %v232_v24, %v231_v22 }
  0xe9   :  { %v235_v32 = vadd.f32 %v234_v15, %v233_v26  ;;  %291 = vxpose.xlu0.b32.end [2/2] (short) (narrow) %v287_v31, 8 }
  0xeb   :  { %v237_v35 = vadd.f32 %v236_v33, %v235_v32 }
  0xed   :  { %v239_v37 = vadd.f32 %v238_v19, %v237_v35 }
  0xef   :  { %v241_v41 = vadd.f32 %v240_v34, %v239_v37 }
  0xf1   :  { %v243_v42 = vadd.f32 %v242_v30, %v241_v41 }
  0xf3   :  { %244 = vst.msk [vmem:[#allocation7] sm:$0x3f] %vm73_vm0, %v243_v42 }
  0xf4   :  { %334 = dma.vmem_to_hbm [thread:$0]  %s330_s26, 128, %s332_s24, [#allocation4]  }
 0x185   :  { %v306_v28 = vpop.trf.xlu0 }
 0x186   :  { %323 = vst.msk [vmem:[#allocation8] sm:$0x3f] %vm322_vm9, %v306_v28 }
 0x187   :  { %345 = dma.vmem_to_hbm [thread:$0]  %s341_s28, 128, %s343_s4, [#allocation9]  }
 0x188   :  { %492 = dma.done.wait [#allocation4], 128  }
 0x189   :  { %493 = vsyncadd [#allocation4], 4294967168 }
 0x18a   :  { %494 = dma.done.wait [#allocation9], 128  }
 0x18b   :  { %495 = vsyncadd [#allocation9], 4294967168 }
 0x18c   :  { %354 = vsyncpa [#allocation3], 1 }
 0x18d   :  { %355 = vsyncpa [#allocation6], 1 }
 0x18e   :  { %356 = vsyncpa [#allocation4], 1 }
 0x18f   :  { %357 = vsyncpa [#allocation9], 1 }

</bundles_post_ra>
